<compile_context>
chip_gen: v7x
topology: tpu7x:2x2x1
jax: 0.10.0
libtpu: 0.0.40
codegen_flags: <defaults>
</compile_context>

<pallas_src>
import functools

import jax
import jax.numpy as jnp
from jax.experimental import pallas as pl
from jax.experimental.pallas import tpu as pltpu

BN_EPS = 1e-5
KSZ = 3


# ---------------------------------------------------------------------------
# Fused kernel: (x + feat) -> BatchNorm(batch stats) -> ReLU -> 3x3 "same" conv
# ---------------------------------------------------------------------------
def _fused_kernel(x_ref, f_ref, gam_ref, bet_ref, p_ref, m_ref, cb_ref, o_ref,
                  *, h, inv_n):
    # x_ref   (B*H, W*Cin)  f32   activation slab (lanes = W*Cin)
    # f_ref   (B*H, W*Cin)  f32   style feature broadcast to rows/lanes
    # gam_ref (1, W*Cin)    f32   BN gamma tiled over W
    # bet_ref (1, W*Cin)    f32   BN beta  tiled over W
    # p_ref   (W*Cin, W*Cin) f32  ones(W,W) (x) eye(Cin): sum over W + broadcast back
    # m_ref   (3*W*Cin, W*Cout) bf16  H-tap band matrices stacked along K
    # cb_ref  (1, W*Cout)   f32   conv bias tiled over W
    # o_ref   (B*H, W*Cout) f32
    bh, wcin = x_ref.shape

    # ----- y = x + style feature; BN batch statistics (two-pass, per channel) ---
    y = x_ref[...] + f_ref[...]
    p = p_ref[...]
    col = jnp.sum(y, axis=0, keepdims=True)                              # (1, WCin)
    mean = jnp.dot(col, p, preferred_element_type=jnp.float32) * inv_n   # per-chan, per lane
    d = y - mean                                                         # center first
    col2 = jnp.sum(d * d, axis=0, keepdims=True)
    var = jnp.dot(col2, p, preferred_element_type=jnp.float32) * inv_n   # biased (train mode)
    scale = gam_ref[...] * jax.lax.rsqrt(var + BN_EPS)
    yr = jnp.maximum(d * scale + bet_ref[...], 0.0)                      # BN + ReLU

    # ----- 3x3 'same' conv.  H halo: XLU roll +/-1 row, edges (incl. the
    #       cross-batch boundary rows) zeroed with a sublane-iota mask.
    #       W halo + all taps: a single K = 3*W*Cin banded matmul (bf16 in,
    #       f32 accumulate). ---------------------------------------------------
    row = jax.lax.broadcasted_iota(jnp.int32, (bh, wcin), 0) % h
    y_dn = jnp.where(row == 0, 0.0, pltpu.roll(yr, shift=1, axis=0))         # yr[i-1]
    y_up = jnp.where(row == h - 1, 0.0, pltpu.roll(yr, shift=bh - 1, axis=0))  # yr[i+1]
    lhs = jnp.concatenate([y_dn, yr, y_up], axis=1).astype(jnp.bfloat16)     # (BH, 3*WCin)
    acc = jnp.dot(lhs, m_ref[...], preferred_element_type=jnp.float32)       # (BH, WCout)
    o_ref[...] = (acc + cb_ref[...]).astype(o_ref.dtype)                     # lane-dense store


# ---------------------------------------------------------------------------
# Wrapper helpers
# ---------------------------------------------------------------------------
def _band_matrices(conv_w, w):
    """conv_w (3,3,Cin,Cout) HWIO -> (3*W*Cin, W*Cout) stacked block-banded mats.

    Row-block kh multiplies the input row (i + kh - 1); within a block,
    m[w_in*Cin+ci, w_out*Cout+co] = conv_w[kh, kw, ci, co] for w_in = w_out+kw-1
    (zeros outside the band bake in the W-direction 'same' padding).
    """
    ksz, _, cin, cout = conv_w.shape
    mats = []
    for kh in range(ksz):
        m = jnp.zeros((w * cin, w * cout), jnp.float32)
        for kw in range(ksz):
            sel = jnp.eye(w, k=1 - kw, dtype=jnp.float32)
            m = m + jnp.kron(sel, conv_w[kh, kw])
        mats.append(m)
    return jnp.concatenate(mats, axis=0)


def normconvstyle_forward(style, x_nchw, params):
    """style: (B, S) f32; x_nchw: (B, Cin, H, W) f32 -> (B, Cout, H, W) f32."""
    B, Cin, H, W = x_nchw.shape
    Cout = params["conv_w"].shape[-1]
    WCin, WCout = W * Cin, W * Cout
    BH = B * H
    assert BH % 8 == 0, "toy kernel assumes B*H is a multiple of 8"

    # NCHW -> lane-dense (B*H, W*Cin) slab (interface cost of the NCHW API).
    x_slab = jnp.transpose(x_nchw, (0, 2, 3, 1)).reshape(BH, WCin)

    # Style Linear once in the wrapper: a single (B,S)@(S,Cin) dot that only
    # feeds the per-batch shift (review: keep the toy matmul off the kernel MXU).
    feat = style @ params["full_w"] + params["full_b"]                    # (B, Cin)
    # Broadcast to rows/lanes (tiny: B*H*W*Cin*4 bytes; at scale this would be
    # broadcast in-kernel or handled by a per-batch-block grid instead).
    f_rows = jnp.broadcast_to(feat[:, None, None, :],
                              (B, H, W, Cin)).reshape(BH, WCin)

    # Small per-lane parameter slabs + the channel-reduction matrix, built once.
    gamma_t = jnp.tile(params["bn_gamma"].reshape(-1), W).reshape(1, WCin)
    beta_t = jnp.tile(params["bn_beta"].reshape(-1), W).reshape(1, WCin)
    cb_t = jnp.tile(params["conv_b"].reshape(-1), W).reshape(1, WCout)
    p_mat = jnp.kron(jnp.ones((W, W), jnp.float32),
                     jnp.eye(Cin, dtype=jnp.float32))                     # (WCin, WCin)
    m_cat = _band_matrices(params["conv_w"], W).astype(jnp.bfloat16)      # (3*WCin, WCout)

    kernel = functools.partial(_fused_kernel, h=H, inv_n=1.0 / (B * H * W))

    # Single fused invocation, no grid: every operand is a full array resident in
    # VMEM (< 0.3 MiB total at this shape).
    out_slab = pl.pallas_call(
        kernel,
        out_shape=jax.ShapeDtypeStruct((BH, WCout), jnp.float32),
    )(x_slab, f_rows, gamma_t, beta_t, p_mat, m_cat, cb_t)

    return jnp.transpose(out_slab.reshape(B, H, W, Cout), (0, 3, 1, 2))


def init_params(key, in_ch, out_ch, style_ch):
    k1, k2, k3, k4 = jax.random.split(key, 4)
    return {
        # Linear(style_ch -> in_ch); stored transposed (S, Cin)
        "full_w": 0.1 * jax.random.normal(k1, (style_ch, in_ch), jnp.float32),
        "full_b": 0.1 * jax.random.normal(k2, (1, in_ch), jnp.float32),
        # BatchNorm2d affine params (PyTorch default init: gamma=1, beta=0)
        "bn_gamma": jnp.ones((1, in_ch), jnp.float32),
        "bn_beta": jnp.zeros((1, in_ch), jnp.float32),
        # Conv2d(in_ch -> out_ch, 3x3) weight in HWIO, plus bias
        "conv_w": 0.1 * jax.random.normal(k3, (KSZ, KSZ, in_ch, out_ch), jnp.float32),
        "conv_b": 0.1 * jax.random.normal(k4, (1, out_ch), jnp.float32),
    }


def _reference(style, x_nchw, p):
    """Pure-JAX f32 reference of the same forward pass (silent sanity check)."""
    feat = style @ p["full_w"] + p["full_b"]
    y = jnp.transpose(x_nchw, (0, 2, 3, 1)) + feat[:, None, None, :]
    mean = jnp.mean(y, axis=(0, 1, 2), keepdims=True)
    var = jnp.mean((y - mean) ** 2, axis=(0, 1, 2), keepdims=True)
    yn = (y - mean) * jax.lax.rsqrt(var + BN_EPS)
    yn = yn * p["bn_gamma"].reshape(1, 1, 1, -1) + p["bn_beta"].reshape(1, 1, 1, -1)
    yr = jnp.maximum(yn, 0.0)
    out = jax.lax.conv_general_dilated(
        yr, p["conv_w"], window_strides=(1, 1), padding="SAME",
        dimension_numbers=("NHWC", "HWIO", "NHWC"),
        precision=jax.lax.Precision.HIGHEST)
    out = out + p["conv_b"].reshape(1, 1, 1, -1)
    return jnp.transpose(out, (0, 3, 1, 2))


if __name__ == "__main__":
    B, Cin, Cout, S, H, W = 2, 8, 8, 16, 16, 16     # W*Cin = W*Cout = 128 lanes

    key = jax.random.PRNGKey(0)
    k_style, k_x, k_p = jax.random.split(key, 3)
    style = jax.random.normal(k_style, (B, S), jnp.float32)
    x = jax.random.normal(k_x, (B, Cin, H, W), jnp.float32)
    params = init_params(k_p, Cin, Cout, S)

    fwd = jax.jit(normconvstyle_forward)
    out = jax.block_until_ready(fwd(style, x, params))

    ref = jax.block_until_ready(_reference(style, x, params))
    assert out.shape == (B, Cout, H, W)
    err = float(jnp.max(jnp.abs(out - ref)))
    # Tolerance accounts for bf16 operand quantization in the conv matmul
    # (accumulation is f32 via preferred_element_type); BN stats stay f32 two-pass.
    assert err < 5e-2, f"mismatch vs. pure-JAX reference: {err}"

    print("KERNEL_OK")
</pallas_src>

<mosaic_0001>
module attributes {stable_mosaic.version = 11 : i64} {
  func.func @_fused_kernel(%arg0: memref<32x128xf32, #tpu.memory_space<vmem>>, %arg1: memref<32x128xf32, #tpu.memory_space<vmem>>, %arg2: memref<1x128xf32, #tpu.memory_space<vmem>>, %arg3: memref<1x128xf32, #tpu.memory_space<vmem>>, %arg4: memref<128x128xf32, #tpu.memory_space<vmem>>, %arg5: memref<384x128xbf16, #tpu.memory_space<vmem>>, %arg6: memref<1x128xf32, #tpu.memory_space<vmem>>, %arg7: memref<32x128xf32, #tpu.memory_space<vmem>>) attributes {dimension_semantics = [], scalar_prefetch = 0 : i64, scratch_operands = 0 : i64, tpu.core_type = #tpu.core_type<tc>} {
    %c0 = arith.constant 0 : index
    %c0_0 = arith.constant 0 : index
    %0 = vector.load %arg0[%c0, %c0_0] : memref<32x128xf32, #tpu.memory_space<vmem>>, vector<32x128xf32>
    %c0_1 = arith.constant 0 : index
    %c0_2 = arith.constant 0 : index
    %1 = vector.load %arg1[%c0_1, %c0_2] : memref<32x128xf32, #tpu.memory_space<vmem>>, vector<32x128xf32>
    %2 = arith.addf %0, %1 : vector<32x128xf32>
    %c0_3 = arith.constant 0 : index
    %c0_4 = arith.constant 0 : index
    %3 = vector.load %arg4[%c0_3, %c0_4] : memref<128x128xf32, #tpu.memory_space<vmem>>, vector<128x128xf32>
    %cst = arith.constant dense<0.000000e+00> : vector<128xf32>
    %4 = vector.multi_reduction <add>, %2, %cst [0] : vector<32x128xf32> to vector<128xf32>
    %5 = vector.shape_cast %4 : vector<128xf32> to vector<1x128xf32>
    %cst_5 = arith.constant dense<0.000000e+00> : vector<1x128xf32>
    %6 = tpu.matmul %5, %3, %cst_5 {dimension_numbers = #tpu.dot_dimension_numbers<[1], [0], [0], [1], [0, 0, 1, 1], [], []>} : vector<1x128xf32>, vector<128x128xf32>, vector<1x128xf32> -> vector<1x128xf32>
    %cst_6 = arith.constant 0.001953125 : f32
    %7 = vector.broadcast %cst_6 : f32 to vector<1x128xf32>
    %8 = arith.mulf %6, %7 : vector<1x128xf32>
    %9 = vector.broadcast %8 : vector<1x128xf32> to vector<32x128xf32>
    %10 = arith.subf %2, %9 : vector<32x128xf32>
    %11 = arith.mulf %10, %10 : vector<32x128xf32>
    %cst_7 = arith.constant dense<0.000000e+00> : vector<128xf32>
    %12 = vector.multi_reduction <add>, %11, %cst_7 [0] : vector<32x128xf32> to vector<128xf32>
    %13 = vector.shape_cast %12 : vector<128xf32> to vector<1x128xf32>
    %cst_8 = arith.constant dense<0.000000e+00> : vector<1x128xf32>
    %14 = tpu.matmul %13, %3, %cst_8 {dimension_numbers = #tpu.dot_dimension_numbers<[1], [0], [0], [1], [0, 0, 1, 1], [], []>} : vector<1x128xf32>, vector<128x128xf32>, vector<1x128xf32> -> vector<1x128xf32>
    %cst_9 = arith.constant 0.001953125 : f32
    %15 = vector.broadcast %cst_9 : f32 to vector<1x128xf32>
    %16 = arith.mulf %14, %15 : vector<1x128xf32>
    %c0_10 = arith.constant 0 : index
    %c0_11 = arith.constant 0 : index
    %17 = vector.load %arg2[%c0_10, %c0_11] : memref<1x128xf32, #tpu.memory_space<vmem>>, vector<1x128xf32>
    %cst_12 = arith.constant 9.99999974E-6 : f32
    %18 = vector.broadcast %cst_12 : f32 to vector<1x128xf32>
    %19 = arith.addf %16, %18 : vector<1x128xf32>
    %20 = math.rsqrt %19 : vector<1x128xf32>
    %21 = arith.mulf %17, %20 : vector<1x128xf32>
    %22 = vector.broadcast %21 : vector<1x128xf32> to vector<32x128xf32>
    %23 = arith.mulf %10, %22 : vector<32x128xf32>
    %c0_13 = arith.constant 0 : index
    %c0_14 = arith.constant 0 : index
    %24 = vector.load %arg3[%c0_13, %c0_14] : memref<1x128xf32, #tpu.memory_space<vmem>>, vector<1x128xf32>
    %25 = vector.broadcast %24 : vector<1x128xf32> to vector<32x128xf32>
    %26 = arith.addf %23, %25 : vector<32x128xf32>
    %cst_15 = arith.constant 0.000000e+00 : f32
    %27 = vector.broadcast %cst_15 : f32 to vector<32x128xf32>
    %28 = arith.maximumf %26, %27 : vector<32x128xf32>
    %29 = tpu.iota {dimensions = array<i32: 0>} : vector<32x128xi32>
    %c16_i32 = arith.constant 16 : i32
    %c0_i32 = arith.constant 0 : i32
    %30 = arith.cmpi eq, %c16_i32, %c0_i32 : i32
    %c1_i32 = arith.constant 1 : i32
    %31 = arith.select %30, %c1_i32, %c16_i32 : i32
    %32 = vector.broadcast %31 : i32 to vector<32x128xi32>
    %33 = arith.remsi %29, %32 : vector<32x128xi32>
    %c0_i32_16 = arith.constant 0 : i32
    %34 = vector.broadcast %c0_i32_16 : i32 to vector<32x128xi32>
    %35 = arith.cmpi ne, %33, %34 : vector<32x128xi32>
    %c0_i32_17 = arith.constant 0 : i32
    %36 = vector.broadcast %c0_i32_17 : i32 to vector<32x128xi32>
    %37 = arith.cmpi slt, %33, %36 : vector<32x128xi32>
    %c0_i32_18 = arith.constant 0 : i32
    %38 = arith.cmpi slt, %31, %c0_i32_18 : i32
    %39 = vector.broadcast %38 : i1 to vector<32x128xi1>
    %40 = vector.broadcast %39 : vector<32x128xi1> to vector<32x128xi1>
    %41 = arith.xori %37, %40 : vector<32x128xi1>
    %42 = arith.andi %41, %35 : vector<32x128xi1>
    %43 = vector.broadcast %31 : i32 to vector<32x128xi32>
    %44 = arith.addi %33, %43 : vector<32x128xi32>
    %45 = arith.select %42, %44, %33 : vector<32x128xi1>, vector<32x128xi32>
    %c0_i32_19 = arith.constant 0 : i32
    %46 = vector.broadcast %c0_i32_19 : i32 to vector<32x128xi32>
    %47 = arith.cmpi eq, %45, %46 : vector<32x128xi32>
    %c1_i32_20 = arith.constant 1 : i32
    %48 = tpu.dynamic_rotate %28 by %c1_i32_20 dim 0 : vector<32x128xf32>, i32 -> vector<32x128xf32>
    %cst_21 = arith.constant 0.000000e+00 : f32
    %49 = vector.broadcast %cst_21 : f32 to vector<32x128xf32>
    %50 = arith.select %47, %49, %48 : vector<32x128xi1>, vector<32x128xf32>
    %c15_i32 = arith.constant 15 : i32
    %51 = vector.broadcast %c15_i32 : i32 to vector<32x128xi32>
    %52 = arith.cmpi eq, %45, %51 : vector<32x128xi32>
    %c31_i32 = arith.constant 31 : i32
    %53 = tpu.dynamic_rotate %28 by %c31_i32 dim 0 : vector<32x128xf32>, i32 -> vector<32x128xf32>
    %cst_22 = arith.constant 0.000000e+00 : f32
    %54 = vector.broadcast %cst_22 : f32 to vector<32x128xf32>
    %55 = arith.select %52, %54, %53 : vector<32x128xi1>, vector<32x128xf32>
    %56 = tpu.concatenate %50, %28, %55 in 1 : vector<32x128xf32>, vector<32x128xf32>, vector<32x128xf32> -> vector<32x384xf32>
    %57 = arith.truncf %56 : vector<32x384xf32> to vector<32x384xbf16>
    %c0_23 = arith.constant 0 : index
    %c0_24 = arith.constant 0 : index
    %58 = vector.load %arg5[%c0_23, %c0_24] : memref<384x128xbf16, #tpu.memory_space<vmem>>, vector<384x128xbf16>
    %cst_25 = arith.constant dense<0.000000e+00> : vector<32x128xf32>
    %59 = tpu.matmul %57, %58, %cst_25 {dimension_numbers = #tpu.dot_dimension_numbers<[1], [0], [0], [1], [0, 0, 1, 1], [], []>} : vector<32x384xbf16>, vector<384x128xbf16>, vector<32x128xf32> -> vector<32x128xf32>
    %c0_26 = arith.constant 0 : index
    %c0_27 = arith.constant 0 : index
    %60 = vector.load %arg6[%c0_26, %c0_27] : memref<1x128xf32, #tpu.memory_space<vmem>>, vector<1x128xf32>
    %61 = vector.broadcast %60 : vector<1x128xf32> to vector<32x128xf32>
    %62 = arith.addf %59, %61 : vector<32x128xf32>
    %c0_28 = arith.constant 0 : index
    %c0_29 = arith.constant 0 : index
    %63 = vector.load %arg7[%c0_28, %c0_29] : memref<32x128xf32, #tpu.memory_space<vmem>>, vector<32x128xf32>
    tpu.vector_store %arg7[%c0_28, %c0_29], %62 {strides = array<i32>} : memref<32x128xf32, #tpu.memory_space<vmem>>, vector<32x128xf32>,
    return
  }
}

</mosaic_0001>

<bundles_post_ra>
// kernel: tile.14
= control target key start
LH: loop header
LB: loop body
LE: loop exit
PB: predicated region body
PF: predicated region fallthrough
CT: control target
= control target key end

     0   :  { %s28_s0 = inlined_call_operand.vmem [shape: f32[8], index: 0, kind: input, shape index: {}]   ;;  %s29_s1 = inlined_call_operand.vmem [shape: f32[16,8], index: 1, kind: output, shape index: {}]  }
   0x1   :  { %v4_v0 = vld [vmem:[%s28_s0] ss:$0 sm:$0xff] }
   0x2   :  { %5 = vst [vmem:[%s29_s1] sm:$0xff] %v4_v0  ;;  %8 = vst [vmem:[%s29_s1 + $0x8] sm:$0xff] %v4_v0 }

// kernel: tile.15
= control target key start
LH: loop header
LB: loop body
LE: loop exit
PB: predicated region body
PF: predicated region fallthrough
CT: control target
= control target key end

     0   :  { %s131_s10 = smov 120   ;;  %s132_s11 = smov 104   ;;  %vm3_vm0 = vcmask 64512   ;;  %vm9_vm1 = vcmask 1048512   ;;  %vm15_vm2 = vcmask 982912   ;;  %vm21_vm3 = vcmask 917312   ;;  %s207_s0 = inlined_call_operand.vmem [shape: f32[16,8], index: 0, kind: input, shape index: {}]   ;;  %s208_s1 = inlined_call_operand.vmem [shape: f32[1,128], index: 1, kind: output, shape index: {}]  }
   0x1   :  { %v101_v0 = vld [vmem:[%s207_s0 + $0xf] sm:$0x1]   ;;  %v103_v1 = vld [vmem:[%s207_s0 + $0xd] sm:$0x1]   ;;  %v102_v2 = vld [vmem:[%s207_s0 + $0xe] sm:$0x1]  }
   0x2   :  { %7 = vrot.lane.b32.xlu0 %v101_v0, %s131_s10  ;;  %19 = vrot.lane.b32.xlu1 %v103_v1, %s132_s11  ;;  %v104_v3 = vld [vmem:[%s207_s0 + $0xc] sm:$0x1]   ;;  %s133_s16 = smov 112   ;;  %s134_s17 = smov 96   ;;  %v105_v4 = vld [vmem:[%s207_s0 + $0xb] sm:$0x1]  }
   0x3   :  { %v106_v5 = vld [vmem:[%s207_s0 + $0xa] sm:$0x1]   ;;  %v2_v6 = vld [vmem:[%s207_s0] sm:$0x1]   ;;  %s135_s24 = smov 88   ;;  %s136_s25 = smov 80  }
   0x4   :  { %4 = vst.msk [vmem:[#allocation0] sm:$0x1] %vm3_vm0, %v2_v6   ;;  %v107_v7 = vld [vmem:[%s207_s0 + $0x9] sm:$0x1]   ;;  %v108_v8 = vld [vmem:[%s207_s0 + $0x8] sm:$0x1]  }
   0x5   :  { %s137_s30 = smov 72   ;;  %s138_s2 = smov 64   ;;  %v109_v9 = vld [vmem:[%s207_s0 + $0x7] sm:$0x1]   ;;  %v110_v10 = vld [vmem:[%s207_s0 + $0x6] sm:$0x1]  }
   0x6   :  { %13 = vrot.lane.b32.xlu0 %v102_v2, %s133_s16  ;;  %25 = vrot.lane.b32.xlu1 %v104_v3, %s134_s17  ;;  %s139_s7 = smov 56   ;;  %s140_s8 = smov 48   ;;  %v111_v11 = vld [vmem:[%s207_s0 + $0x5] sm:$0x1]   ;;  %v112_v12 = vld [vmem:[%s207_s0 + $0x4] sm:$0x1]  }
   0x7   :  { %s141_s13 = smov 40   ;;  %s142_s14 = smov 32   ;;  %v113_v13 = vld [vmem:[%s207_s0 + $0x3] sm:$0x1]   ;;  %v114_v14 = vld [vmem:[%s207_s0 + $0x2] sm:$0x1]  }
   0x8   :  { %s143_s19 = smov 24   ;;  %s144_s20 = smov 16   ;;  %v115_v15 = vld [vmem:[%s207_s0 + $0x1] sm:$0x1]   ;;  %vm27_vm4 = vcmask 851712   ;;  %vm33_vm5 = vcmask 786112  }
   0x9   :  { %s145_s0 = smov 8   ;;  %vm39_vm6 = vcmask 720512   ;;  %vm45_vm7 = vcmask 654912   ;;  %vm51_vm8 = vcmask 589312   ;;  %vm57_vm9 = vcmask 523712  }
   0xa   :  { %31 = vrot.lane.b32.xlu0 %v105_v4, %s135_s24  ;;  %37 = vrot.lane.b32.xlu1 %v106_v5, %s136_s25  ;;  %vm63_vm10 = vcmask 458112   ;;  %vm69_vm11 = vcmask 392512   ;;  %vm75_vm12 = vcmask 326912   ;;  %vm81_vm13 = vcmask 261312  }
   0xb   :  { %vm87_vm14 = vcmask 195712   ;;  %vm93_vm15 = vcmask 130112  }
   0xe   :  { %43 = vrot.lane.b32.xlu0 %v107_v7, %s137_s30  ;;  %49 = vrot.lane.b32.xlu1 %v108_v8, %s138_s2 }
  0x12   :  { %55 = vrot.lane.b32.xlu0 %v109_v9, %s139_s7  ;;  %61 = vrot.lane.b32.xlu1 %v110_v10, %s140_s8 }
  0x16   :  { %67 = vrot.lane.b32.xlu0 %v111_v11, %s141_s13  ;;  %73 = vrot.lane.b32.xlu1 %v112_v12, %s142_s14 }
  0x1a   :  { %79 = vrot.lane.b32.xlu0 %v113_v13, %s143_s19  ;;  %85 = vrot.lane.b32.xlu1 %v114_v14, %s144_s20 }
  0x1e   :  { %91 = vrot.lane.b32.xlu0 %v115_v15, %s145_s0 }
  0x74   :  { %v8_v16 = vpop.permute.xlu0 %7   ;;  %v20_v17 = vpop.permute.xlu1 %19  }
  0x75   :  { %10 = vst.msk [vmem:[#allocation0] sm:$0x1] %vm9_vm1, %v8_v16  }
  0x78   :  { %v14_v18 = vpop.permute.xlu0 %13   ;;  %v26_v19 = vpop.permute.xlu1 %25  }
  0x79   :  { %16 = vst.msk [vmem:[#allocation0] sm:$0x1] %vm15_vm2, %v14_v18  }
  0x7a   :  { %22 = vst.msk [vmem:[#allocation0] sm:$0x1] %vm21_vm3, %v20_v17  }
  0x7b   :  { %28 = vst.msk [vmem:[#allocation0] sm:$0x1] %vm27_vm4, %v26_v19  }
  0x7c   :  { %v32_v20 = vpop.permute.xlu0 %31   ;;  %v38_v21 = vpop.permute.xlu1 %37  }
  0x7d   :  { %34 = vst.msk [vmem:[#allocation0] sm:$0x1] %vm33_vm5, %v32_v20  }
  0x7e   :  { %40 = vst.msk [vmem:[#allocation0] sm:$0x1] %vm39_vm6, %v38_v21  }
  0x80   :  { %v44_v22 = vpop.permute.xlu0 %43   ;;  %v50_v23 = vpop.permute.xlu1 %49  }
  0x81   :  { %46 = vst.msk [vmem:[#allocation0] sm:$0x1] %vm45_vm7, %v44_v22  }
  0x82   :  { %52 = vst.msk [vmem:[#allocation0] sm:$0x1] %vm51_vm8, %v50_v23  }
  0x84   :  { %v56_v24 = vpop.permute.xlu0 %55   ;;  %v62_v25 = vpop.permute.xlu1 %61  }
  0x85   :  { %58 = vst.msk [vmem:[#allocation0] sm:$0x1] %vm57_vm9, %v56_v24  }
  0x86   :  { %64 = vst.msk [vmem:[#allocation0] sm:$0x1] %vm63_vm10, %v62_v25  }
  0x88   :  { %v68_v26 = vpop.permute.xlu0 %67   ;;  %v74_v27 = vpop.permute.xlu1 %73  }
  0x89   :  { %70 = vst.msk [vmem:[#allocation0] sm:$0x1] %vm69_vm11, %v68_v26  }
  0x8a   :  { %76 = vst.msk [vmem:[#allocation0] sm:$0x1] %vm75_vm12, %v74_v27  }
  0x8c   :  { %v80_v28 = vpop.permute.xlu0 %79   ;;  %v86_v29 = vpop.permute.xlu1 %85  }
  0x8d   :  { %82 = vst.msk [vmem:[#allocation0] sm:$0x1] %vm81_vm13, %v80_v28  }
  0x8e   :  { %88 = vst.msk [vmem:[#allocation0] sm:$0x1] %vm87_vm14, %v86_v29  }
  0x90   :  { %v92_v30 = vpop.permute.xlu0 %91  }
  0x91   :  { %94 = vst.msk [vmem:[#allocation0] sm:$0x1] %vm93_vm15, %v92_v30  }
  0x98   :  { %v98_v31 = vld [vmem:[#allocation0] sm:$0x1] }
  0x99   :  { %100 = vst [vmem:[%s208_s1] sm:$0x1] %v98_v31 }

// kernel: normconvstyle_forward.1
= control target key start
LH: loop header
LB: loop body
LE: loop exit
PB: predicated region body
PF: predicated region fallthrough
CT: control target
= control target key end

     0   :  { %v940_v0 = vmov 0.0|0.0   ;;  %vm941_vm0 = vmmov 0   ;;  %v942_v4 = vmov 0.0   ;;  %v135_v48 = vlaneseq  ;;  %s1240_s4 = inlined_call_operand.vmem [shape: f32[128,128], index: 4, kind: input, shape index: {}]   ;;  %s1241_s0 = inlined_call_operand.vmem [shape: f32[32,128], index: 0, kind: input, shape index: {}]   ;;  %s1242_s1 = inlined_call_operand.vmem [shape: f32[32,128], index: 1, kind: input, shape index: {}]   ;;  %s1243_s5 = inlined_call_operand.vmem [shape: bf16[384,128], index: 5, kind: input, shape index: {}]   ;;  %s1244_s2 = inlined_call_operand.vmem [shape: f32[1,128], index: 2, kind: input, shape index: {}]   ;;  %s1245_s3 = inlined_call_operand.vmem [shape: f32[1,128], index: 3, kind: input, shape index: {}]   ;;  %s1246_s6 = inlined_call_operand.vmem [shape: f32[1,128], index: 6, kind: input, shape index: {}]   ;;  %s1247_s7 = inlined_call_operand.vmem [shape: f32[32,128], index: 7, kind: output, shape index: {}]  }
   0x1   :  { %862 = vmatprep.subr.bf16.mxu0 %v940_v0  ;;  %v39_v1 = vld [vmem:[%s1240_s4] sm:$0xff]  ;;  %v40_v2 = vld [vmem:[%s1240_s4 + $0x8] sm:$0xff]  ;;  %v41_v3 = vld [vmem:[%s1240_s4 + $0x10] sm:$0xff]  ;;  %804 = vmatprep.mubr.msk.f32.mxu0 %vm941_vm0, %v942_v4  ;;  %vm943_vm6 = vmmov 1  }
   0x2   :  { %v863_v5 = vpack.c.bf16 %v40_v2, %v39_v1  ;;  %v42_v6 = vld [vmem:[%s1240_s4 + $0x18] sm:$0xff]  ;;  %886 = vmatprep.subr.bf16.mxu1 %v940_v0  ;;  %839 = vmatprep.mubr.msk.f32.mxu1 %vm941_vm0, %v942_v4  ;;  %v43_v8 = vld [vmem:[%s1240_s4 + $0x20] sm:$0xff]  ;;  %v44_v9 = vld [vmem:[%s1240_s4 + $0x28] sm:$0xff]  ;;  %v1078_v49 = vshrl.u32 %v135_v48, 7 }
   0x3   :  { %v866_v7 = vpack.c.bf16 %v42_v6, %v41_v3  ;;  %v27_v10 = vld [vmem:[%s1241_s0] sm:$0xff]  ;;  %v28_v11 = vld [vmem:[%s1241_s0 + $0x8] sm:$0xff]  ;;  %v29_v12 = vld [vmem:[%s1241_s0 + $0x10] sm:$0xff]  ;;  %v869_v15 = vpack.c.bf16 %v44_v9, %v43_v8 }
   0x4   :  { %864 = vmatpush3.bf16.msra.mxu0 %v863_v5  ;;  %888 = vmatpush3.bf16.msra.mxu1 %v863_v5  ;;  %v30_v13 = vld [vmem:[%s1241_s0 + $0x18] sm:$0xff]  ;;  %v31_v14 = vld [vmem:[%s1242_s1] sm:$0xff]  ;;  %v32_v16 = vld [vmem:[%s1242_s1 + $0x8] sm:$0xff]  ;;  %v137_v50 = vsub.s32 0, %v1078_v49  ;;  %vm317_vm1 = vcmp.lt.s32.totalorder %v1078_v49, 1  ;;  %vm334_vm3 = vcmp.lt.s32.totalorder %v1078_v49, 7 }
   0x5   :  { %865 = vmatprep.subr.bf16.mxu0 %v940_v0  ;;  %889 = vmatprep.subr.bf16.mxu1 %v940_v0  ;;  %v33_v17 = vld [vmem:[%s1242_s1 + $0x10] sm:$0xff]  ;;  %v34_v18 = vld [vmem:[%s1242_s1 + $0x18] sm:$0xff]  ;;  %v1030_v19 = vadd.f32 %v31_v14, %v27_v10  ;;  %v36_v22 = vadd.f32 %v32_v16, %v28_v11  ;;  %v47_v27 = vld [vmem:[%s1240_s4 + $0x40] sm:$0xff] }
   0x6   :  { %v45_v20 = vld [vmem:[%s1240_s4 + $0x30] sm:$0xff]  ;;  %v46_v21 = vld [vmem:[%s1240_s4 + $0x38] sm:$0xff]  ;;  %v37_v23 = vadd.f32 %v33_v17, %v29_v12  ;;  %v38_v24 = vadd.f32 %v34_v18, %v30_v13  ;;  %v48_v28 = vld [vmem:[%s1240_s4 + $0x48] sm:$0xff] }
   0x7   :  { %v55_v25 = vadd.f32 %v36_v22, %v1030_v19  ;;  %v872_v26 = vpack.c.bf16 %v46_v21, %v45_v20  ;;  %v875_v31 = vpack.c.bf16 %v48_v28, %v47_v27  ;;  %v49_v32 = vld [vmem:[%s1240_s4 + $0x50] sm:$0xff]  ;;  %v50_v33 = vld [vmem:[%s1240_s4 + $0x58] sm:$0xff]  ;;  %v51_v37 = vld [vmem:[%s1240_s4 + $0x60] sm:$0xff] }
   0x8   :  { %867 = vmatpush3.bf16.msra.mxu0 %v866_v7  ;;  %891 = vmatpush3.bf16.msra.mxu1 %v866_v7  ;;  %v878_v36 = vpack.c.bf16 %v50_v33, %v49_v32  ;;  %v52_v38 = vld [vmem:[%s1240_s4 + $0x68] sm:$0xff]  ;;  %v53_v42 = vld [vmem:[%s1240_s4 + $0x70] sm:$0xff]  ;;  %v54_v43 = vld [vmem:[%s1240_s4 + $0x78] sm:$0xff] }
   0x9   :  { %868 = vmatprep.subr.bf16.mxu0 %v940_v0  ;;  %892 = vmatprep.subr.bf16.mxu1 %v940_v0  ;;  %v56_v29 = vadd.f32 %v55_v25, %v37_v23  ;;  %v881_v41 = vpack.c.bf16 %v52_v38, %v51_v37  ;;  %v884_v45 = vpack.c.bf16 %v54_v43, %v53_v42  ;;  %v914_v47 = vld [vmem:[%s1243_s5 + $0x40] sm:$0xff]   ;;  %v917_v10 = vld [vmem:[%s1243_s5 + $0x48] sm:$0xff]   ;;  %v920_v13 = vld [vmem:[%s1243_s5 + $0x50] sm:$0xff]   ;;  %v258_v38 = vadd.s32 8, %v1078_v49 }
   0xa   :  { %v915_v8 = vld [vmem:[%s1243_s5] sm:$0xff]   ;;  %v918_v11 = vld [vmem:[%s1243_s5 + $0x8] sm:$0xff]   ;;  %v921_v14 = vld [vmem:[%s1243_s5 + $0x10] sm:$0xff]  }
   0xb   :  { %v57_v30 = vadd.f32 %v56_v29, %v38_v24  ;;  %v916_v9 = vld [vmem:[%s1243_s5 + $0x80] sm:$0xff]   ;;  %v919_v12 = vld [vmem:[%s1243_s5 + $0x88] sm:$0xff]   ;;  %v923_v16 = vld [vmem:[%s1243_s5 + $0x58] sm:$0xff]  }
   0xc   :  { %870 = vmatpush3.bf16.msra.mxu0 %v869_v15  ;;  %894 = vmatpush3.bf16.msra.mxu1 %v869_v15  ;;  %v922_v15 = vld [vmem:[%s1243_s5 + $0x90] sm:$0xff]   ;;  %v924_v17 = vld [vmem:[%s1243_s5 + $0x18] sm:$0xff]   ;;  %v927_v20 = vld [vmem:[%s1243_s5 + $0x20] sm:$0xff]  }
   0xd   :  { %871 = vmatprep.subr.bf16.mxu0 %v940_v0  ;;  %895 = vmatprep.subr.bf16.mxu1 %v940_v0  ;;  %v58_v34 = vrot.slane %v57_v30, 4  ;;  %v925_v18 = vld [vmem:[%s1243_s5 + $0x98] sm:$0xff]   ;;  %v928_v21 = vld [vmem:[%s1243_s5 + $0xa0] sm:$0xff]   ;;  %v932_v25 = vld [vmem:[%s1243_s5 + $0x70] sm:$0xff]  }
   0xe   :  { %v933_v27 = vld [vmem:[%s1243_s5 + $0x30] sm:$0xff]   ;;  %v935_v28 = vld [vmem:[%s1243_s5 + $0x78] sm:$0xff]  }
   0xf   :  { %v59_v35 = vadd.f32 %v58_v34, %v57_v30  ;;  %v936_v29 = vld [vmem:[%s1243_s5 + $0x38] sm:$0xff]  }
  0x10   :  { %873 = vmatpush3.bf16.msra.mxu0 %v872_v26  ;;  %897 = vmatpush3.bf16.msra.mxu1 %v872_v26  ;;  %v934_v26 = vld [vmem:[%s1243_s5 + $0xb0] sm:$0xff]   ;;  %v937_v30 = vld [vmem:[%s1243_s5 + $0xb8] sm:$0xff]  }
  0x11   :  { %874 = vmatprep.subr.bf16.mxu0 %v940_v0  ;;  %898 = vmatprep.subr.bf16.mxu1 %v940_v0  ;;  %v60_v39 = vrot.slane %v59_v35, 2 }
  0x13   :  { %v61_v40 = vadd.f32 %v60_v39, %v59_v35  ;;  %v227_v35 = vld [vmem:[%s1244_s2] sm:$0x1] }
  0x14   :  { %876 = vmatpush3.bf16.msra.mxu0 %v875_v31  ;;  %900 = vmatpush3.bf16.msra.mxu1 %v875_v31 }
  0x15   :  { %877 = vmatprep.subr.bf16.mxu0 %v940_v0  ;;  %901 = vmatprep.subr.bf16.mxu1 %v940_v0  ;;  %v62_v44 = vrot.slane %v61_v40, 1 }
  0x17   :  { %v63_v46 = vadd.f32 %v62_v44, %v61_v40  ;;  %v654_v40 = vld [vmem:[%s1245_s3] ss:$0 sm:$0xff] }
  0x18   :  { %879 = vmatpush3.bf16.msra.mxu0 %v878_v36  ;;  %903 = vmatpush3.bf16.msra.mxu1 %v878_v36 }
  0x19   :  { %880 = vmatprep.subr.bf16.mxu0 %v940_v0  ;;  %904 = vmatprep.subr.bf16.mxu1 %v940_v0 }
  0x1c   :  { %882 = vmatpush3.bf16.msra.mxu0 %v881_v41  ;;  %906 = vmatpush3.bf16.msra.mxu1 %v881_v41  ;;  %v260_v41 = vadd.s32 24, %v1078_v49 }
  0x1d   :  { %883 = vmatprep.subr.bf16.mxu0 %v940_v0  ;;  %907 = vmatprep.subr.bf16.mxu1 %v940_v0 }
  0x20   :  { %885 = vmatpush3.bf16.msra.mxu0 %v884_v45  ;;  %909 = vmatpush3.bf16.msra.mxu1 %v884_v45 }
  0x21   :  { %734 = vmatprep.subr.bf16.mxu0 %v914_v47  ;;  %842 = vmatprep.subr.bf16.mxu1 %v916_v9  ;;  %v272_v47 = vand.u32 15, %v258_v38 }
  0x23   :  { %805 = vmatmul.mubr.f32.vlgmr.msra.gmra.mrb[0].mxu0 %v63_v46  ;;  %v265_v46 = vand.u32 15, %v1078_v49  ;;  %vm1191_vm4 = vcmp.ne.s32.totalorder %v272_v47, 15 }
  0x24   :  { %735 = vmatpush3.bf16.msra.mxu0 %v915_v8  ;;  %vm689_vm8 = vmpackc.low %vm1191_vm4, %vm943_vm6 }
  0x25   :  { %736 = vmatprep.subr.bf16.mxu0 %v917_v10  ;;  %vm1186_vm2 = vcmp.ne.s32.totalorder %v265_v46, 0 }
  0x26   :  { %vm681_vm7 = vmpackc.low %vm943_vm6, %vm1186_vm2 }
  0x28   :  { %737 = vmatpush3.bf16.msra.mxu0 %v918_v11 }
  0x29   :  { %738 = vmatprep.subr.bf16.mxu0 %v920_v13 }
  0x2c   :  { %739 = vmatpush3.bf16.msra.mxu0 %v921_v14 }
  0x2d   :  { %740 = vmatprep.subr.bf16.mxu0 %v923_v16 }
  0x30   :  { %741 = vmatpush3.bf16.msra.mxu0 %v924_v17 }
  0xf6   :  { %v130_v51 = vpop.f32.mrb[0].mxu0 }
  0xf7   :  { %v134_v52 = vmul.f32 0.001953125, %v130_v51  ;;  %v806_v53 = vpop.f32.mrb[1].mxu0 }
  0xf8   :  { %v286_v53 = vand.u32 15, %v260_v41 }
  0xf9   :  { %v138_v54 = vrot.slane %v134_v52, %v137_v50 }
  0xfa   :  { %vm1195_vm5 = vcmp.ne.s32.totalorder %v286_v53, 15 }
  0xfb   :  { %v1084_v55 = vsub.f32 %v1030_v19, %v138_v54  ;;  %v1086_v56 = vsub.f32 %v36_v22, %v138_v54  ;;  %v1088_v57 = vsub.f32 %v37_v23, %v138_v54  ;;  %v1090_v58 = vsub.f32 %v38_v24, %v138_v54  ;;  %v926_v19 = vld [vmem:[%s1243_s5 + $0x60] sm:$0xff]   ;;  %v929_v22 = vld [vmem:[%s1243_s5 + $0x68] sm:$0xff]   ;;  %vm693_vm9 = vmpackc.low %vm1195_vm5, %vm943_vm6 }
  0xfc   :  { %742 = vmatprep.subr.bf16.mxu0 %v926_v19  ;;  %v930_v23 = vld [vmem:[%s1243_s5 + $0x28] sm:$0xff]   ;;  %v259_v54 = vadd.s32 16, %v1078_v49 }
  0xfd   :  { %v143_v59 = vmul.f32 %v1084_v55, %v1084_v55  ;;  %v144_v60 = vmul.f32 %v1086_v56, %v1086_v56  ;;  %v145_v61 = vmul.f32 %v1088_v57, %v1088_v57  ;;  %v146_v63 = vmul.f32 %v1090_v58, %v1090_v58  ;;  %743 = vmatpush3.bf16.msra.mxu0 %v927_v20  ;;  %v931_v24 = vld [vmem:[%s1243_s5 + $0xa8] sm:$0xff]  }
  0xfe   :  { %744 = vmatprep.subr.bf16.mxu0 %v929_v22  ;;  %v279_v8 = vand.u32 15, %v259_v54 }
  0xff   :  { %v147_v62 = vadd.f32 %v144_v60, %v143_v59 }
 0x100   :  { %vm697_vm10 = vcmp.ne.s32.totalorder %v279_v8, 0 }
 0x101   :  { %v148_v0 = vadd.f32 %v147_v62, %v145_v61  ;;  %745 = vmatpush3.bf16.msra.mxu0 %v930_v23  ;;  %vm685_vm11 = vmpackc.low %vm943_vm6, %vm697_vm10  ;;  %v655_v23 = vld [vmem:[%s1246_s6] ss:$0 sm:$0xff] }
 0x102   :  { %746 = vmatprep.subr.bf16.mxu0 %v932_v25 }
 0x103   :  { %v149_v1 = vadd.f32 %v148_v0, %v146_v63 }
 0x105   :  { %v150_v2 = vrot.slane %v149_v1, 4  ;;  %747 = vmatpush3.bf16.msra.mxu0 %v933_v27 }
 0x106   :  { %748 = vmatprep.subr.bf16.mxu0 %v935_v28 }
 0x107   :  { %v151_v3 = vadd.f32 %v150_v2, %v149_v1 }
 0x109   :  { %v152_v4 = vrot.slane %v151_v3, 2  ;;  %749 = vmatpush3.bf16.msra.mxu0 %v936_v29 }
 0x10b   :  { %v153_v5 = vadd.f32 %v152_v4, %v151_v3 }
 0x10d   :  { %v154_v6 = vrot.slane %v153_v5, 1 }
 0x10f   :  { %v155_v7 = vadd.f32 %v154_v6, %v153_v5 }
 0x111   :  { %840 = vmatmul.mubr.f32.vlgmr.msra.gmra.mrb[0].mxu1 %v155_v7 }
 0x112   :  { %843 = vmatpush3.bf16.msra.mxu1 %v916_v9 }
 0x113   :  { %844 = vmatprep.subr.bf16.mxu1 %v919_v12 }
 0x116   :  { %845 = vmatpush3.bf16.msra.mxu1 %v919_v12 }
 0x117   :  { %846 = vmatprep.subr.bf16.mxu1 %v922_v15 }
 0x11a   :  { %847 = vmatpush3.bf16.msra.mxu1 %v922_v15 }
 0x11b   :  { %848 = vmatprep.subr.bf16.mxu1 %v925_v18 }
 0x11e   :  { %849 = vmatpush3.bf16.msra.mxu1 %v925_v18 }
 0x11f   :  { %850 = vmatprep.subr.bf16.mxu1 %v928_v21 }
 0x122   :  { %851 = vmatpush3.bf16.msra.mxu1 %v928_v21 }
 0x123   :  { %852 = vmatprep.subr.bf16.mxu1 %v931_v24 }
 0x126   :  { %853 = vmatpush3.bf16.msra.mxu1 %v931_v24 }
 0x127   :  { %854 = vmatprep.subr.bf16.mxu1 %v934_v26 }
 0x12a   :  { %855 = vmatpush3.bf16.msra.mxu1 %v934_v26 }
 0x12b   :  { %856 = vmatprep.subr.bf16.mxu1 %v937_v30 }
 0x12e   :  { %857 = vmatpush3.bf16.msra.mxu1 %v937_v30 }
 0x1e4   :  { %v222_v31 = vpop.f32.mrb[0].mxu1 }
 0x1e5   :  { %v226_v32 = vmul.f32 0.001953125, %v222_v31  ;;  %v841_v33 = vpop.f32.mrb[1].mxu1 }
 0x1e7   :  { %v228_v34 = vadd.f32 1e-05, %v226_v32 }
 0x1e9   :  { %938 = vrsqrt.f32 %v228_v34 }
 0x1f3   :  { %v939_v36 = vpop.eup %938 }
 0x1f4   :  { %v230_v37 = vmul.f32 %v939_v36, %v227_v35 }
 0x1f6   :  { %v235_v39 = vrot.slane %v230_v37, %v137_v50 }
 0x1f8   :  { %v237_v42 = vmul.f32 %v235_v39, %v1084_v55  ;;  %v238_v43 = vmul.f32 %v235_v39, %v1086_v56  ;;  %v239_v44 = vmul.f32 %v235_v39, %v1088_v57  ;;  %v240_v45 = vmul.f32 %v235_v39, %v1090_v58 }
 0x1fa   :  { %v248_v48 = vadd.f32 %v654_v40, %v237_v42  ;;  %v249_v51 = vadd.f32 %v654_v40, %v238_v43  ;;  %v250_v50 = vadd.f32 %v654_v40, %v239_v44  ;;  %v251_v52 = vadd.f32 %v654_v40, %v240_v45 }
 0x1fc   :  { %v252_v59 = vmax.f32 %v248_v48, 0.0  ;;  %v253_v55 = vmax.f32 %v249_v51, 0.0  ;;  %v255_v60 = vmax.f32 %v251_v52, 0.0  ;;  %v254_v56 = vmax.f32 %v250_v50, 0.0 }
 0x1fe   :  { %v313_v61 = vrot.slane %v252_v59, 7  ;;  %v314_v62 = vrot.slane %v253_v55, 7  ;;  %v344_v63 = vpack.c.bf16 %v253_v55, %v252_v59  ;;  %v316_v0 = vrot.slane %v255_v60, 7 }
 0x1ff   :  { %v330_v1 = vrot.slane %v252_v59, 1  ;;  %v331_v2 = vrot.slane %v253_v55, 1  ;;  %v332_v3 = vrot.slane %v254_v56, 1  ;;  %v333_v7 = vrot.slane %v255_v60, 1 }
 0x200   :  { %580 = vmatprep.mubr.bf16.mxu0 %v344_v63  ;;  %v320_v5 = vsel %vm317_vm1, %v313_v61, %v314_v62  ;;  %v321_v6 = vsel %vm317_vm1, %v316_v0, %v313_v61  ;;  %v347_v12 = vpack.c.bf16 %v255_v60, %v254_v56  ;;  %v315_v16 = vrot.slane %v254_v56, 7 }
 0x201   :  { %v682_v9 = vpack.c.bf16 %v320_v5, %v321_v6  ;;  %v336_v10 = vsel %vm334_vm3, %v331_v2, %v332_v3  ;;  %v337_v11 = vsel %vm334_vm3, %v330_v1, %v331_v2  ;;  %v335_v14 = vsel %vm334_vm3, %v332_v3, %v333_v7 }
 0x202   :  { %v690_v13 = vpack.c.bf16 %v336_v10, %v337_v11  ;;  %v338_v15 = vsel %vm334_vm3, %v333_v7, %v330_v1  ;;  %v318_v18 = vsel %vm317_vm1, %v315_v16, %v316_v0  ;;  %v319_v19 = vsel %vm317_vm1, %v314_v62, %v315_v16 }
 0x203   :  { %683 = vmatmul.mubr.msk.bf16.vlgmr.msra.gmra.mrb[4].mxu0 %vm681_vm7, %v682_v9  ;;  %v694_v17 = vpack.c.bf16 %v338_v15, %v335_v14  ;;  %v686_v20 = vpack.c.bf16 %v318_v18, %v319_v19 }
 0x204   :  { %858 = vmatprep.mubr.msk.bf16.mxu1 %vm689_vm8, %v690_v13  ;;  %588 = vmatprep.mubr.bf16.mxu0 %v347_v12 }
 0x205   :  { %859 = vmatmul.mubr.msk.bf16.vlgmr.msra.gmra.mrb[4].mxu1 %vm693_vm9, %v694_v17 }
 0x20b   :  { %687 = vmatmul.mubr.msk.bf16.gmra.mrb[8].mxu0 %vm685_vm11, %v686_v20 }
 0x2d6   :  { %v750_v21 = vpop.f32.mrb[4].mxu0 }
 0x2d7   :  { %v751_v22 = vpop.f32.mrb[5].mxu0 }
 0x2d8   :  { %v752_v24 = vadd.f32 %v751_v22, %v750_v21  ;;  %v860_v25 = vpop.f32.mrb[4].mxu1  ;;  %v753_v26 = vpop.f32.mrb[6].mxu0 }
 0x2d9   :  { %v631_v27 = vpop.f32.mrb[5].mxu1  ;;  %v754_v28 = vpop.f32.mrb[7].mxu0 }
 0x2da   :  { %v583_v29 = vadd.f32 %v752_v24, %v655_v23  ;;  %v755_v30 = vadd.f32 %v754_v28, %v753_v26  ;;  %v861_v31 = vpop.f32.mrb[6].mxu1 }
 0x2db   :  { %v634_v49 = vpop.f32.mrb[7].mxu1 }
 0x2dc   :  { %v632_v32 = vadd.f32 %v631_v27, %v583_v29  ;;  %v586_v33 = vadd.f32 %v755_v30, %v655_v23 }
 0x2de   :  { %646 = vst [vmem:[%s1247_s7] sm:$0xff] %v632_v32  ;;  %v635_v34 = vadd.f32 %v634_v49, %v586_v33  ;;  %v756_v35 = vpop.f32.mrb[8].mxu0 }
 0x2df   :  { %v757_v36 = vpop.f32.mrb[9].mxu0 }
 0x2e0   :  { %647 = vst [vmem:[%s1247_s7 + $0x8] sm:$0xff] %v635_v34  ;;  %v758_v37 = vadd.f32 %v757_v36, %v756_v35  ;;  %v759_v38 = vpop.f32.mrb[10].mxu0 }
 0x2e1   :  { %v760_v39 = vpop.f32.mrb[11].mxu0 }
 0x2e2   :  { %v591_v40 = vadd.f32 %v758_v37, %v655_v23  ;;  %v761_v41 = vadd.f32 %v760_v39, %v759_v38 }
 0x2e4   :  { %v640_v42 = vadd.f32 %v860_v25, %v591_v40  ;;  %v594_v43 = vadd.f32 %v761_v41, %v655_v23 }
 0x2e6   :  { %648 = vst [vmem:[%s1247_s7 + $0x10] sm:$0xff] %v640_v42  ;;  %v643_v44 = vadd.f32 %v861_v31, %v594_v43 }
 0x2e8   :  { %649 = vst [vmem:[%s1247_s7 + $0x18] sm:$0xff] %v643_v44 }

</bundles_post_ra>
